<compile_context>
chip_gen: v6e
topology: v6e:2x2x1
jax: 0.10.0
libtpu: 0.0.40
codegen_flags: <defaults>
</compile_context>

<pallas_src>
import functools

import jax
import jax.numpy as jnp
from jax.experimental import pallas as pl
from jax.experimental.pallas import tpu as pltpu

_BN_EPS = 1e-5
_COUPLING_EPS = 1e-10
_VMEM_LIMIT = 32 * 1024 * 1024     # safe scoped-VMEM limit on v5e/v6e/v7x


def _hidden(x1, w1t, b1, w2t, b2):
    """relu(W2 @ relu(W1 @ x1 + b1) + b2); feature-major, x1 is (d, TB)."""
    h = jnp.dot(w1t, x1, preferred_element_type=jnp.float32) + b1
    h = jnp.maximum(h, 0.0)
    h = jnp.dot(w2t, h, preferred_element_type=jnp.float32) + b2
    return jnp.maximum(h, 0.0)


def _stats_kernel(x1_ref, w1t_ref, b1_ref, w2t_ref, b2_ref, sum_ref, ssq_ref,
                  *, valid_b, tb, inner, mask_tail):
    """Pass 1: per-feature sum / sumsq of pre-BN hidden activations.

    Grid is (split, inner): outer axis "parallel" (one partial accumulator per
    v7x TensorCore), inner axis is the "arbitrary" batch reduction.
    """
    @pl.when(pl.program_id(1) == 0)
    def _():
        sum_ref[...] = jnp.zeros_like(sum_ref)
        ssq_ref[...] = jnp.zeros_like(ssq_ref)

    h = _hidden(x1_ref[...], w1t_ref[...], b1_ref[...], w2t_ref[...], b2_ref[...])
    if mask_tail:
        # zero padded batch columns so they don't pollute the BN statistics
        tile = pl.program_id(0) * inner + pl.program_id(1)
        col = tile * tb + jax.lax.broadcasted_iota(jnp.int32, (1, tb), 1)
        h = jnp.where(col < valid_b, h, 0.0)
    sum_ref[...] += jnp.sum(h, axis=1, keepdims=True)
    ssq_ref[...] += jnp.sum(h * h, axis=1, keepdims=True)


def _transform_kernel(x1_ref, x2_ref, w1t_ref, b1_ref, w2t_ref, b2_ref,
                      hsum_ref, hssq_ref, gamma_ref, beta_ref,
                      w3t_ref, b3_ref, y1_ref, dlp_ref,
                      *, reverse, inv_b, out_dim, split):
    """Pass 2: hidden net + in-kernel BatchNorm finalize + affine coupling."""
    h = _hidden(x1_ref[...], w1t_ref[...], b1_ref[...], w2t_ref[...], b2_ref[...])

    # BatchNorm finalize folded into the kernel ((H,1) vectors; rsqrt -> EUP).
    if split == 1:
        hsum, hssq = hsum_ref[0], hssq_ref[0]
    else:
        hsum = hsum_ref[0] + hsum_ref[1]
        hssq = hssq_ref[0] + hssq_ref[1]
    mean = hsum * inv_b
    var = jnp.maximum(hssq * inv_b - mean * mean, 0.0)   # biased var (training-mode BN)
    rstd = jax.lax.rsqrt(var + _BN_EPS)
    bn_scale = gamma_ref[...] * rstd
    bn_shift = beta_ref[...] - mean * bn_scale
    h = h * bn_scale + bn_shift

    # Fused scale/shift heads: one (2*out_dim, H) @ (H, TB) matmul; the +2.0
    # scale offset is already folded into the first out_dim rows of the bias.
    st = jnp.dot(w3t_ref[...], h, preferred_element_type=jnp.float32) + b3_ref[...]
    z = st[:out_dim, :]
    shift = st[out_dim:, :]

    scale = jax.nn.sigmoid(z) + _COUPLING_EPS
    # log(sigmoid(z)) = -softplus(-z) (stable); missing +eps inside the log vs.
    # the reference is O(1e-10).
    softplus_negz = jnp.maximum(-z, 0.0) + jnp.log(1.0 + jnp.exp(-jnp.abs(z)))
    logdetjac = -jnp.sum(softplus_negz, axis=0, keepdims=True)     # (1, TB)

    x2 = x2_ref[...]
    if not reverse:
        y1_ref[...] = x2 * scale + shift
        dlp_ref[...] = -logdetjac
    else:
        y1_ref[...] = (x2 - shift) / scale        # exact divide (matches reference)
        dlp_ref[...] = logdetjac


def _tiling(B, target=2048):
    """Pick (TB, padded_B, nb).

    Big tiles amortize the ~0.35us per-grid-step overhead; TB <= B/2 keeps the
    "parallel" grid axes shardable across v7x's two TensorCores; irregular large
    batches are padded to a multiple of 128 for unmasked lane-dense stores.
    """
    if B <= 256:
        return B, B, 1
    tb = min(target, 128 * (B // 256))        # multiple of 128, guarantees nb >= 2
    nb = -(-B // tb)
    return tb, tb * nb, nb


def coupling_layer_forward(x, params, *, swap=False, reverse=False, logpx=None):
    """Mirrors CouplingLayer.forward. Returns (y, logpx + delta_logp or None, delta_logp)."""
    B, D = x.shape
    d = D - D // 2                          # self.d
    out_dim = D - d
    w1, b1, w2, b2, gamma, beta, w3, b3 = params
    H = w1.shape[1]

    # --- split halves; avoid materializing the swapped copy when D is even ---
    if swap and d != out_dim:
        # odd D: the swapped conditioning half straddles both original halves
        xs = jnp.concatenate([x[:, d:], x[:, :d]], axis=1)
        x1, x2 = xs[:, :d], xs[:, d:]
    elif swap:
        x1, x2 = x[:, d:], x[:, :d]
    else:
        x1, x2 = x[:, :d], x[:, d:]

    # --- wrapper-side layout plumbing (feature-major, lane-dense over batch) ---
    x1t = x1.T                              # (d, B)       conditioning half
    x2t = x2.T                              # (out_dim, B) transformed half
    w1t = w1.T                              # (H, d)
    w2t = w2.T                              # (H, H)
    b1c = b1.reshape(H, 1)
    b2c = b2.reshape(H, 1)
    gammac = gamma.reshape(H, 1)
    betac = beta.reshape(H, 1)
    w3t = w3.T                              # (2*out_dim, H): scale rows, then shift rows
    b3c = b3.reshape(2 * out_dim, 1).at[:out_dim].add(2.0)   # fold the +2.0 offset

    TB, Bp, nb = _tiling(B)
    mask_tail = Bp != B
    if mask_tail:
        x1t = jnp.pad(x1t, ((0, 0), (0, Bp - B)))
        x2t = jnp.pad(x2t, ((0, 0), (0, Bp - B)))

    split = 2 if (nb >= 2 and nb % 2 == 0) else 1    # 2-way stats split (v7x megacore)
    inner = nb // split
    f32 = jnp.float32

    # ---- pass 1: BatchNorm batch statistics (training-mode semantics) ----
    fixed2 = lambda shape: pl.BlockSpec(shape, lambda c, i: (0, 0))
    hsum, hssq = pl.pallas_call(
        functools.partial(_stats_kernel, valid_b=B, tb=TB, inner=inner,
                          mask_tail=mask_tail),
        out_shape=(jax.ShapeDtypeStruct((split, H, 1), f32),
                   jax.ShapeDtypeStruct((split, H, 1), f32)),
        grid=(split, inner),
        in_specs=[pl.BlockSpec((d, TB), lambda c, i: (0, c * inner + i)),
                  fixed2((H, d)), fixed2((H, 1)), fixed2((H, H)), fixed2((H, 1))],
        out_specs=(pl.BlockSpec((None, H, 1), lambda c, i: (c, 0, 0)),
                   pl.BlockSpec((None, H, 1), lambda c, i: (c, 0, 0))),
        compiler_params=pltpu.CompilerParams(
            dimension_semantics=("parallel", "arbitrary"),
            vmem_limit_bytes=_VMEM_LIMIT),
    )(x1t, w1t, b1c, w2t, b2c)

    # ---- pass 2: coupling transform (BN finalize folded into the kernel) ----
    fixed1 = lambda shape: pl.BlockSpec(shape, lambda i: (0,) * len(shape))
    tiled = lambda rows: pl.BlockSpec((rows, TB), lambda i: (0, i))
    y1t, dlp = pl.pallas_call(
        functools.partial(_transform_kernel, reverse=reverse, inv_b=1.0 / B,
                          out_dim=out_dim, split=split),
        out_shape=(jax.ShapeDtypeStruct((out_dim, Bp), f32),
                   jax.ShapeDtypeStruct((1, Bp), f32)),
        grid=(nb,),
        in_specs=[tiled(d), tiled(out_dim),
                  fixed1((H, d)), fixed1((H, 1)), fixed1((H, H)), fixed1((H, 1)),
                  fixed1((split, H, 1)), fixed1((split, H, 1)),
                  fixed1((H, 1)), fixed1((H, 1)),
                  fixed1((2 * out_dim, H)), fixed1((2 * out_dim, 1))],
        out_specs=(tiled(out_dim), tiled(1)),
        compiler_params=pltpu.CompilerParams(
            dimension_semantics=("parallel",),       # batch tiles independent (megacore)
            vmem_limit_bytes=_VMEM_LIMIT),
    )(x1t, x2t, w1t, b1c, w2t, b2c, hsum, hssq, gammac, betac, w3t, b3c)

    if mask_tail:
        y1t = y1t[:, :B]
        dlp = dlp[:, :B]
    y1 = y1t.T                                       # (B, out_dim)
    y = jnp.concatenate([y1, x1], axis=1) if swap else jnp.concatenate([x1, y1], axis=1)
    delta_logp = dlp[0]                              # (B,)

    if logpx is None:
        return y, None, delta_logp
    logpx = jnp.squeeze(logpx)                       # matches torch.squeeze semantics
    return y, logpx + delta_logp, delta_logp


def init_params(key, d_full, intermediate_dim=64, w_init_sigma=0.001):
    """Deterministic parameter init. Shapes follow the PyTorch module __init__."""
    d = d_full - d_full // 2
    out2 = (d_full - d) * 2
    ks = jax.random.split(key, 8)
    w1 = w_init_sigma * jax.random.normal(ks[0], (d, intermediate_dim), jnp.float32)
    b1 = 0.01 * jax.random.normal(ks[1], (1, intermediate_dim), jnp.float32)
    w2 = w_init_sigma * jax.random.normal(ks[2], (intermediate_dim, intermediate_dim), jnp.float32)
    b2 = 0.01 * jax.random.normal(ks[3], (1, intermediate_dim), jnp.float32)
    gamma = 1.0 + 0.01 * jax.random.normal(ks[4], (1, intermediate_dim), jnp.float32)
    beta = 0.01 * jax.random.normal(ks[5], (1, intermediate_dim), jnp.float32)
    w3 = w_init_sigma * jax.random.normal(ks[6], (intermediate_dim, out2), jnp.float32)
    b3 = 0.01 * jax.random.normal(ks[7], (1, out2), jnp.float32)
    return (w1, b1, w2, b2, gamma, beta, w3, b3)


def _reference_forward(x, params, swap=False, reverse=False):
    """Pure-JAX reference (PyTorch-exact) for correctness checking."""
    B, D = x.shape
    d = D - D // 2
    if swap:
        x = jnp.concatenate([x[:, d:], x[:, :d]], axis=1)
    w1, b1, w2, b2, gamma, beta, w3, b3 = params
    h = jnp.maximum(x[:, :d] @ w1 + b1, 0.0)
    h = jnp.maximum(h @ w2 + b2, 0.0)
    mean = jnp.mean(h, axis=0, keepdims=True)
    var = jnp.mean((h - mean) ** 2, axis=0, keepdims=True)
    h = (h - mean) / jnp.sqrt(var + _BN_EPS) * gamma + beta
    s_t = h @ w3 + b3
    out_dim = D - d
    scale = jax.nn.sigmoid(s_t[:, :out_dim] + 2.0) + _COUPLING_EPS
    shift = s_t[:, out_dim:]
    logdetjac = jnp.sum(jnp.log(scale), axis=1)
    if not reverse:
        y1 = x[:, d:] * scale + shift
        dlp = -logdetjac
    else:
        y1 = (x[:, d:] - shift) / scale
        dlp = logdetjac
    y = (jnp.concatenate([x[:, :d], y1], 1) if not swap
         else jnp.concatenate([y1, x[:, :d]], 1))
    return y, dlp


if __name__ == "__main__":
    key = jax.random.PRNGKey(0)
    B, D, H = 8, 8, 64                       # batch=8, dim=8 (even), intermediate=64
    kx, kp, kl, kb, kc = jax.random.split(key, 5)
    x = jax.random.normal(kx, (B, D), jnp.float32)
    logpx = jax.random.normal(kl, (B, 1), jnp.float32)
    params = init_params(kp, D, intermediate_dim=H)

    # forward path (+ logpx accumulation)
    y, new_logpx, delta_logp = coupling_layer_forward(
        x, params, swap=False, reverse=False, logpx=logpx)
    jax.block_until_ready((y, new_logpx, delta_logp))
    y_ref, dlp_ref = _reference_forward(x, params, swap=False, reverse=False)
    assert jnp.allclose(y, y_ref, atol=1e-5, rtol=1e-5)
    assert jnp.allclose(delta_logp, dlp_ref, atol=1e-5, rtol=1e-5)
    assert jnp.allclose(new_logpx, jnp.squeeze(logpx) + dlp_ref, atol=1e-5, rtol=1e-5)

    # swap + reverse path (exact divide -> same tolerance as forward)
    y2, _, dlp2 = coupling_layer_forward(x, params, swap=True, reverse=True)
    jax.block_until_ready((y2, dlp2))
    y2_ref, dlp2_ref = _reference_forward(x, params, swap=True, reverse=True)
    assert jnp.allclose(y2, y2_ref, atol=1e-5, rtol=1e-5)
    assert jnp.allclose(dlp2, dlp2_ref, atol=1e-5, rtol=1e-5)

    # larger batch: batch-tiled grid (nb=2) + 2-way-split stats pass
    xb = jax.random.normal(kb, (1024, D), jnp.float32)
    yb, _, dlpb = coupling_layer_forward(xb, params, swap=False, reverse=False)
    jax.block_until_ready((yb, dlpb))
    yb_ref, dlpb_ref = _reference_forward(xb, params, swap=False, reverse=False)
    assert jnp.allclose(yb, yb_ref, atol=1e-5, rtol=1e-5)
    assert jnp.allclose(dlpb, dlpb_ref, atol=1e-5, rtol=1e-5)

    # irregular batch: padding to a multiple of 128 + masked BN statistics
    xc = jax.random.normal(kc, (1000, D), jnp.float32)
    yc, _, dlpc = coupling_layer_forward(xc, params, swap=False, reverse=False)
    jax.block_until_ready((yc, dlpc))
    yc_ref, dlpc_ref = _reference_forward(xc, params, swap=False, reverse=False)
    assert jnp.allclose(yc, yc_ref, atol=1e-5, rtol=1e-5)
    assert jnp.allclose(dlpc, dlpc_ref, atol=1e-5, rtol=1e-5)

    print("KERNEL_OK")
</pallas_src>

<mosaic_0001>
module attributes {stable_mosaic.version = 11 : i64} {
  func.func @_stats_kernel(%arg0: i32, %arg1: i32, %arg2: memref<4x8xf32, #tpu.memory_space<vmem>>, %arg3: memref<64x4xf32, #tpu.memory_space<vmem>>, %arg4: memref<64x1xf32, #tpu.memory_space<vmem>>, %arg5: memref<64x64xf32, #tpu.memory_space<vmem>>, %arg6: memref<64x1xf32, #tpu.memory_space<vmem>>, %arg7: memref<1x64x1xf32, #tpu.memory_space<vmem>>, %arg8: memref<1x64x1xf32, #tpu.memory_space<vmem>>) attributes {dimension_semantics = [#tpu.dimension_semantics<parallel>, #tpu.dimension_semantics<arbitrary>], iteration_bounds = array<i64: 1, 1>, scalar_prefetch = 0 : i64, scratch_operands = 0 : i64, tpu.core_type = #tpu.core_type<tc>, window_params = [{transform_indices = @transform_0, window_bounds = array<i64: 4, 8>}, {pipeline_mode = #tpu.pipeline_mode<synchronous>, transform_indices = @transform_1, window_bounds = array<i64: 64, 4>}, {pipeline_mode = #tpu.pipeline_mode<synchronous>, transform_indices = @transform_2, window_bounds = array<i64: 64, 1>}, {pipeline_mode = #tpu.pipeline_mode<synchronous>, transform_indices = @transform_3, window_bounds = array<i64: 64, 64>}, {pipeline_mode = #tpu.pipeline_mode<synchronous>, transform_indices = @transform_4, window_bounds = array<i64: 64, 1>}, {transform_indices = @transform_5, window_bounds = array<i64: 1, 64, 1>}, {transform_indices = @transform_6, window_bounds = array<i64: 1, 64, 1>}]} {
    %c0_i32 = arith.constant 0 : i32
    %0 = arith.cmpi eq, %arg1, %c0_i32 : i32
    %1 = arith.extui %0 : i1 to i32
    %c0_i32_0 = arith.constant 0 : i32
    %2 = arith.cmpi ne, %1, %c0_i32_0 : i32
    scf.if %2 {
      %cst_27 = arith.constant 0.000000e+00 : f32
      %35 = vector.broadcast %cst_27 : f32 to vector<64x1xf32>
      %c0_28 = arith.constant 0 : index
      %c0_29 = arith.constant 0 : index
      %c0_30 = arith.constant 0 : index
      %36 = vector.load %arg7[%c0_28, %c0_29, %c0_30] : memref<1x64x1xf32, #tpu.memory_space<vmem>>, vector<1x64x1xf32>
      %37 = vector.shape_cast %36 : vector<1x64x1xf32> to vector<64x1xf32>
      %38 = vector.shape_cast %35 : vector<64x1xf32> to vector<1x64x1xf32>
      tpu.vector_store %arg7[%c0_28, %c0_29, %c0_30], %38 {strides = array<i32>} : memref<1x64x1xf32, #tpu.memory_space<vmem>>, vector<1x64x1xf32>,
      %cst_31 = arith.constant 0.000000e+00 : f32
      %39 = vector.broadcast %cst_31 : f32 to vector<64x1xf32>
      %c0_32 = arith.constant 0 : index
      %c0_33 = arith.constant 0 : index
      %c0_34 = arith.constant 0 : index
      %40 = vector.load %arg8[%c0_32, %c0_33, %c0_34] : memref<1x64x1xf32, #tpu.memory_space<vmem>>, vector<1x64x1xf32>
      %41 = vector.shape_cast %40 : vector<1x64x1xf32> to vector<64x1xf32>
      %42 = vector.shape_cast %39 : vector<64x1xf32> to vector<1x64x1xf32>
      tpu.vector_store %arg8[%c0_32, %c0_33, %c0_34], %42 {strides = array<i32>} : memref<1x64x1xf32, #tpu.memory_space<vmem>>, vector<1x64x1xf32>,
    } else {
    }
    %c0 = arith.constant 0 : index
    %c0_1 = arith.constant 0 : index
    %3 = vector.load %arg2[%c0, %c0_1] : memref<4x8xf32, #tpu.memory_space<vmem>>, vector<4x8xf32>
    %c0_2 = arith.constant 0 : index
    %c0_3 = arith.constant 0 : index
    %4 = vector.load %arg3[%c0_2, %c0_3] : memref<64x4xf32, #tpu.memory_space<vmem>>, vector<64x4xf32>
    %c0_4 = arith.constant 0 : index
    %c0_5 = arith.constant 0 : index
    %5 = vector.load %arg4[%c0_4, %c0_5] : memref<64x1xf32, #tpu.memory_space<vmem>>, vector<64x1xf32>
    %c0_6 = arith.constant 0 : index
    %c0_7 = arith.constant 0 : index
    %6 = vector.load %arg5[%c0_6, %c0_7] : memref<64x64xf32, #tpu.memory_space<vmem>>, vector<64x64xf32>
    %c0_8 = arith.constant 0 : index
    %c0_9 = arith.constant 0 : index
    %7 = vector.load %arg6[%c0_8, %c0_9] : memref<64x1xf32, #tpu.memory_space<vmem>>, vector<64x1xf32>
    %cst = arith.constant dense<0.000000e+00> : vector<64x8xf32>
    %8 = tpu.matmul %4, %3, %cst {dimension_numbers = #tpu.dot_dimension_numbers<[1], [0], [0], [1], [0, 0, 1, 1], [], []>} : vector<64x4xf32>, vector<4x8xf32>, vector<64x8xf32> -> vector<64x8xf32>
    %9 = vector.broadcast %5 : vector<64x1xf32> to vector<64x8xf32>
    %10 = arith.addf %8, %9 : vector<64x8xf32>
    %cst_10 = arith.constant 0.000000e+00 : f32
    %11 = vector.broadcast %cst_10 : f32 to vector<64x8xf32>
    %12 = arith.maximumf %10, %11 : vector<64x8xf32>
    %cst_11 = arith.constant dense<0.000000e+00> : vector<64x8xf32>
    %13 = tpu.matmul %6, %12, %cst_11 {dimension_numbers = #tpu.dot_dimension_numbers<[1], [0], [0], [1], [0, 0, 1, 1], [], []>} : vector<64x64xf32>, vector<64x8xf32>, vector<64x8xf32> -> vector<64x8xf32>
    %14 = vector.broadcast %7 : vector<64x1xf32> to vector<64x8xf32>
    %15 = arith.addf %13, %14 : vector<64x8xf32>
    %cst_12 = arith.constant 0.000000e+00 : f32
    %16 = vector.broadcast %cst_12 : f32 to vector<64x8xf32>
    %17 = arith.maximumf %15, %16 : vector<64x8xf32>
    %c0_13 = arith.constant 0 : index
    %c0_14 = arith.constant 0 : index
    %c0_15 = arith.constant 0 : index
    %18 = vector.load %arg7[%c0_13, %c0_14, %c0_15] : memref<1x64x1xf32, #tpu.memory_space<vmem>>, vector<1x64x1xf32>
    %19 = vector.shape_cast %18 : vector<1x64x1xf32> to vector<64x1xf32>
    %cst_16 = arith.constant dense<0.000000e+00> : vector<64xf32>
    %20 = vector.multi_reduction <add>, %17, %cst_16 [1] : vector<64x8xf32> to vector<64xf32>
    %21 = vector.shape_cast %20 : vector<64xf32> to vector<64x1xf32>
    %22 = arith.addf %19, %21 : vector<64x1xf32>
    %c0_17 = arith.constant 0 : index
    %c0_18 = arith.constant 0 : index
    %c0_19 = arith.constant 0 : index
    %23 = vector.load %arg7[%c0_17, %c0_18, %c0_19] : memref<1x64x1xf32, #tpu.memory_space<vmem>>, vector<1x64x1xf32>
    %24 = vector.shape_cast %23 : vector<1x64x1xf32> to vector<64x1xf32>
    %25 = vector.shape_cast %22 : vector<64x1xf32> to vector<1x64x1xf32>
    tpu.vector_store %arg7[%c0_17, %c0_18, %c0_19], %25 {strides = array<i32>} : memref<1x64x1xf32, #tpu.memory_space<vmem>>, vector<1x64x1xf32>,
    %c0_20 = arith.constant 0 : index
    %c0_21 = arith.constant 0 : index
    %c0_22 = arith.constant 0 : index
    %26 = vector.load %arg8[%c0_20, %c0_21, %c0_22] : memref<1x64x1xf32, #tpu.memory_space<vmem>>, vector<1x64x1xf32>
    %27 = vector.shape_cast %26 : vector<1x64x1xf32> to vector<64x1xf32>
    %28 = arith.mulf %17, %17 : vector<64x8xf32>
    %cst_23 = arith.constant dense<0.000000e+00> : vector<64xf32>
    %29 = vector.multi_reduction <add>, %28, %cst_23 [1] : vector<64x8xf32> to vector<64xf32>
    %30 = vector.shape_cast %29 : vector<64xf32> to vector<64x1xf32>
    %31 = arith.addf %27, %30 : vector<64x1xf32>
    %c0_24 = arith.constant 0 : index
    %c0_25 = arith.constant 0 : index
    %c0_26 = arith.constant 0 : index
    %32 = vector.load %arg8[%c0_24, %c0_25, %c0_26] : memref<1x64x1xf32, #tpu.memory_space<vmem>>, vector<1x64x1xf32>
    %33 = vector.shape_cast %32 : vector<1x64x1xf32> to vector<64x1xf32>
    %34 = vector.shape_cast %31 : vector<64x1xf32> to vector<1x64x1xf32>
    tpu.vector_store %arg8[%c0_24, %c0_25, %c0_26], %34 {strides = array<i32>} : memref<1x64x1xf32, #tpu.memory_space<vmem>>, vector<1x64x1xf32>,
    return
  }
  func.func @transform_0(%arg0: i32, %arg1: i32) -> (i32, i32) {
    %c1_i32 = arith.constant 1 : i32
    %0 = arith.muli %arg0, %c1_i32 : i32
    %1 = arith.addi %0, %arg1 : i32
    %c0_i32 = arith.constant 0 : i32
    %c0_i32_0 = arith.constant 0 : i32
    return %c0_i32, %1 : i32, i32
  }
  func.func @transform_1(%arg0: i32, %arg1: i32) -> (i32, i32) {
    %c0_i32 = arith.constant 0 : i32
    %c0_i32_0 = arith.constant 0 : i32
    %c0_i32_1 = arith.constant 0 : i32
    return %c0_i32, %c0_i32_0 : i32, i32
  }
  func.func @transform_2(%arg0: i32, %arg1: i32) -> (i32, i32) {
    %c0_i32 = arith.constant 0 : i32
    %c0_i32_0 = arith.constant 0 : i32
    %c0_i32_1 = arith.constant 0 : i32
    return %c0_i32, %c0_i32_0 : i32, i32
  }
  func.func @transform_3(%arg0: i32, %arg1: i32) -> (i32, i32) {
    %c0_i32 = arith.constant 0 : i32
    %c0_i32_0 = arith.constant 0 : i32
    %c0_i32_1 = arith.constant 0 : i32
    return %c0_i32, %c0_i32_0 : i32, i32
  }
  func.func @transform_4(%arg0: i32, %arg1: i32) -> (i32, i32) {
    %c0_i32 = arith.constant 0 : i32
    %c0_i32_0 = arith.constant 0 : i32
    %c0_i32_1 = arith.constant 0 : i32
    return %c0_i32, %c0_i32_0 : i32, i32
  }
  func.func @transform_5(%arg0: i32, %arg1: i32) -> (i32, i32, i32) {
    %c0_i32 = arith.constant 0 : i32
    %c0_i32_0 = arith.constant 0 : i32
    %c0_i32_1 = arith.constant 0 : i32
    return %arg0, %c0_i32, %c0_i32_0 : i32, i32, i32
  }
  func.func @transform_6(%arg0: i32, %arg1: i32) -> (i32, i32, i32) {
    %c0_i32 = arith.constant 0 : i32
    %c0_i32_0 = arith.constant 0 : i32
    %c0_i32_1 = arith.constant 0 : i32
    return %arg0, %c0_i32, %c0_i32_0 : i32, i32, i32
  }
}

</mosaic_0001>

<bundles_post_ra>
// kernel: tpu_custom_call.1
= control target key start
LH: loop header
LB: loop body
LE: loop exit
PB: predicated region body
PF: predicated region fallthrough
CT: control target
= control target key end

     0   :  { %vm158_vm0 = vcmask 1043456   ;;  %vm133_vm1 = vcmask 31744   ;;  %v677_v3 = vmov 0   ;;  %vm315_vm2 = vcmask 523264   ;;  %s1021_s0 = inlined_call_operand.vmem [shape: f32[4,8], index: 0, kind: input, shape index: {}]   ;;  %s1022_s1 = inlined_call_operand.vmem [shape: f32[64,4], index: 1, kind: input, shape index: {}]   ;;  %s1023_s2 = inlined_call_operand.vmem [shape: f32[64,1], index: 2, kind: input, shape index: {}]   ;;  %s1024_s4 = inlined_call_operand.vmem [shape: f32[64,1], index: 4, kind: input, shape index: {}]   ;;  %s1025_s3 = inlined_call_operand.vmem [shape: f32[64,64], index: 3, kind: input, shape index: {}]   ;;  %s1026_s5 = inlined_call_operand.vmem [shape: f32[1,64,1], index: 5, kind: output, shape index: {0}]   ;;  %s1027_s6 = inlined_call_operand.vmem [shape: f32[1,64,1], index: 6, kind: output, shape index: {1}]  }
   0x1   :  { %v60_v0 = vld [vmem:[%s1021_s0] sm:$0xf]  ;;  %v62_v2 = vld [vmem:[%s1022_s1 + $0x8] sm:$0xff]  ;;  %675 = vset.pattern.permute.xlu0 %v677_v3  ;;  %676 = vset.pattern.permute.xlu1 %v677_v3  ;;  %v63_v4 = vld [vmem:[%s1022_s1 + $0x10] sm:$0xff]  ;;  %vm43_vm3 = vcmask 7168   ;;  %vm461_vm4 = vcmask 64512  }
   0x2   :  { %v61_v1 = vld [vmem:[%s1022_s1] sm:$0xff]  ;;  %615 = vmatprep.subr.msk.mxu0 %vm158_vm0, %v60_v0  ;;  %v76_v5 = vld [vmem:[%s1023_s2 + $0x38] sm:$0xff]  ;;  %v74_v6 = vld [vmem:[%s1023_s2 + $0x28] sm:$0xff] }
   0x3   :  { %617 = vmatprep.mubr.msk.f32.mxu0 %vm133_vm1, %v61_v1  ;;  %616 = vmatpush3.msk.msra.mxu0 %vm158_vm0, %v60_v0  ;;  %v64_v7 = vld [vmem:[%s1022_s1 + $0x18] sm:$0xff]  ;;  %v65_v8 = vld [vmem:[%s1022_s1 + $0x20] sm:$0xff]  ;;  %v75_v9 = vld [vmem:[%s1023_s2 + $0x30] sm:$0xff] }
   0x4   :  { %618 = vmatmul.mubr.msk.f32.vlgmr.msra.gmra.mxu0 %vm133_vm1, %v62_v2  ;;  %130 = vperm.xlu0 %675, %v76_v5   ;;  %v73_v10 = vld [vmem:[%s1023_s2 + $0x20] sm:$0xff]  ;;  %v66_v11 = vld [vmem:[%s1022_s1 + $0x28] sm:$0xff]  ;;  %v67_v12 = vld [vmem:[%s1022_s1 + $0x30] sm:$0xff]  ;;  %v678_v2 = vmov 0.0  }
   0x5   :  { %620 = vmatprep.mubr.msk.f32.mxu0 %vm133_vm1, %v63_v4  ;;  %120 = vperm.xlu1 %676, %v74_v6   ;;  %v72_v13 = vld [vmem:[%s1023_s2 + $0x18] sm:$0xff]  ;;  %v71_v14 = vld [vmem:[%s1023_s2 + $0x10] sm:$0xff]  ;;  %v70_v16 = vld [vmem:[%s1023_s2 + $0x8] sm:$0xff]  ;;  %47 = vst.msk [vmem:[%s1026_s5 + $0x18] sm:$0xff] %vm43_vm3, %v678_v2 }
   0x6   :  { %v68_v15 = vld [vmem:[%s1022_s1 + $0x38] sm:$0xff]  ;;  %v69_v17 = vld [vmem:[%s1023_s2] sm:$0xff]  ;;  %v86_v19 = vld [vmem:[%s1024_s4 + $0x8] sm:$0xff]  ;;  %44 = vst.msk [vmem:[%s1026_s5] sm:$0xff] %vm43_vm3, %v678_v2 }
   0x7   :  { %v85_v18 = vld [vmem:[%s1024_s4] sm:$0xff]  ;;  %v87_v20 = vld [vmem:[%s1024_s4 + $0x10] sm:$0xff]  ;;  %v88_v21 = vld [vmem:[%s1024_s4 + $0x18] sm:$0xff]  ;;  %45 = vst.msk [vmem:[%s1026_s5 + $0x8] sm:$0xff] %vm43_vm3, %v678_v2 }
   0x8   :  { %621 = vmatmul.mubr.msk.f32.gmra.mxu0 %vm133_vm1, %v64_v7  ;;  %125 = vperm.xlu0 %675, %v75_v9   ;;  %v89_v22 = vld [vmem:[%s1024_s4 + $0x20] sm:$0xff]  ;;  %v90_v23 = vld [vmem:[%s1024_s4 + $0x28] sm:$0xff]  ;;  %v91_v24 = vld [vmem:[%s1024_s4 + $0x30] sm:$0xff]  ;;  %46 = vst.msk [vmem:[%s1026_s5 + $0x10] sm:$0xff] %vm43_vm3, %v678_v2 }
   0x9   :  { %623 = vmatprep.mubr.msk.f32.mxu0 %vm133_vm1, %v65_v8  ;;  %115 = vperm.xlu1 %676, %v73_v10   ;;  %v92_v25 = vld [vmem:[%s1024_s4 + $0x38] sm:$0xff]  ;;  %v77_v26 = vld [vmem:[%s1025_s3] sm:$0xff]  ;;  %v79_v27 = vld [vmem:[%s1025_s3 + $0x10] sm:$0xff]  ;;  %48 = vst.msk [vmem:[%s1026_s5 + $0x20] sm:$0xff] %vm43_vm3, %v678_v2 }
   0xa   :  { %648 = vmatprep.mubr.msk.f32.mxu1 %vm315_vm2, %v79_v27  ;;  %v78_v60 = vld [vmem:[%s1025_s3 + $0x8] sm:$0xff]  ;;  %v80_v61 = vld [vmem:[%s1025_s3 + $0x18] sm:$0xff]  ;;  %v81_v62 = vld [vmem:[%s1025_s3 + $0x20] sm:$0xff]  ;;  %49 = vst.msk [vmem:[%s1026_s5 + $0x28] sm:$0xff] %vm43_vm3, %v678_v2 }
   0xb   :  { %v82_v63 = vld [vmem:[%s1025_s3 + $0x28] sm:$0xff]  ;;  %v83_v0 = vld [vmem:[%s1025_s3 + $0x30] sm:$0xff]  ;;  %v84_v1 = vld [vmem:[%s1025_s3 + $0x38] sm:$0xff]  ;;  %50 = vst.msk [vmem:[%s1026_s5 + $0x30] sm:$0xff] %vm43_vm3, %v678_v2 }
   0xc   :  { %624 = vmatmul.mubr.msk.f32.gmra.mxu0 %vm133_vm1, %v66_v11  ;;  %110 = vperm.xlu0 %675, %v72_v13   ;;  %51 = vst.msk [vmem:[%s1026_s5 + $0x38] sm:$0xff] %vm43_vm3, %v678_v2  ;;  %52 = vst.msk [vmem:[%s1027_s6] sm:$0xff] %vm43_vm3, %v678_v2 }
   0xd   :  { %626 = vmatprep.mubr.msk.f32.mxu0 %vm133_vm1, %v67_v12  ;;  %105 = vperm.xlu1 %676, %v71_v14   ;;  %53 = vst.msk [vmem:[%s1027_s6 + $0x8] sm:$0xff] %vm43_vm3, %v678_v2  ;;  %54 = vst.msk [vmem:[%s1027_s6 + $0x10] sm:$0xff] %vm43_vm3, %v678_v2 }
   0xe   :  { %55 = vst.msk [vmem:[%s1027_s6 + $0x18] sm:$0xff] %vm43_vm3, %v678_v2  ;;  %56 = vst.msk [vmem:[%s1027_s6 + $0x20] sm:$0xff] %vm43_vm3, %v678_v2 }
   0xf   :  { %57 = vst.msk [vmem:[%s1027_s6 + $0x28] sm:$0xff] %vm43_vm3, %v678_v2  ;;  %58 = vst.msk [vmem:[%s1027_s6 + $0x30] sm:$0xff] %vm43_vm3, %v678_v2 }
  0x10   :  { %627 = vmatmul.mubr.msk.f32.gmra.mxu0 %vm133_vm1, %v68_v15  ;;  %100 = vperm.xlu0 %675, %v70_v16   ;;  %59 = vst.msk [vmem:[%s1027_s6 + $0x38] sm:$0xff] %vm43_vm3, %v678_v2 }
  0x11   :  { %95 = vperm.xlu1 %676, %v69_v17   ;;  %645 = vmatprep.mubr.msk.f32.mxu0 %vm315_vm2, %v77_v26 }
  0x13   :  { %v503_v2 = vld [vmem:[%s1027_s6] sm:$0xff] }
  0x14   :  { %277 = vperm.xlu0 %675, %v85_v18  }
  0x15   :  { %282 = vperm.xlu1 %676, %v86_v19  }
  0x18   :  { %287 = vperm.xlu0 %675, %v87_v20  }
  0x19   :  { %292 = vperm.xlu1 %676, %v88_v21  }
  0x1c   :  { %297 = vperm.xlu0 %675, %v89_v22  }
  0x1d   :  { %302 = vperm.xlu1 %676, %v90_v23  }
  0x20   :  { %307 = vperm.xlu0 %675, %v91_v24  }
  0x21   :  { %312 = vperm.xlu1 %676, %v92_v25  }
  0x7f   :  { %v131_v30 = vpop.permute.xlu0 %130 }
  0x80   :  { %v121_v32 = vpop.permute.xlu1 %120 }
  0x83   :  { %v126_v35 = vpop.permute.xlu0 %125 }
  0x84   :  { %v116_v37 = vpop.permute.xlu1 %115 }
  0x87   :  { %v111_v44 = vpop.permute.xlu0 %110 }
  0x88   :  { %v106_v47 = vpop.permute.xlu1 %105 }
  0x8b   :  { %v101_v52 = vpop.permute.xlu0 %100 }
  0x8c   :  { %v96_v55 = vpop.permute.xlu1 %95 }
  0x8f   :  { %v278_v4 = vpop.permute.xlu0 %277 }
  0x90   :  { %v283_v3 = vpop.permute.xlu1 %282 }
  0x93   :  { %v288_v8 = vpop.permute.xlu0 %287 }
  0x94   :  { %v293_v5 = vpop.permute.xlu1 %292 }
  0x97   :  { %v298_v24 = vpop.permute.xlu0 %297 }
  0xc4   :  { %v619_v28 = vpop.f32.mrf.mxu0 }
  0xc5   :  { %v234_v53 = vadd.f32 %v619_v28, %v101_v52 }
  0xc6   :  { %v228_v29 = vpop.f32.mrf.mxu0 }
  0xc7   :  { %v229_v56 = vadd.f32 %v228_v29, %v96_v55  ;;  %v268_v58 = vmax.f32 %v234_v53, 0.0 }
  0xc8   :  { %v622_v31 = vpop.f32.mrf.mxu0 }
  0xc9   :  { %v244_v48 = vadd.f32 %v622_v31, %v111_v44  ;;  %v267_v59 = vmax.f32 %v229_v56, 0.0 }
  0xca   :  { %v238_v33 = vpop.f32.mrf.mxu0 }
  0xcb   :  { %v239_v50 = vadd.f32 %v238_v33, %v106_v47  ;;  %v270_v54 = vmax.f32 %v244_v48, 0.0 }
  0xcc   :  { %v625_v34 = vpop.f32.mrf.mxu0 }
  0xcd   :  { %v254_v41 = vadd.f32 %v625_v34, %v121_v32  ;;  %v269_v57 = vmax.f32 %v239_v50, 0.0 }
  0xce   :  { %v248_v36 = vpop.f32.mrf.mxu0 }
  0xcf   :  { %v249_v45 = vadd.f32 %v248_v36, %v116_v37  ;;  %v272_v49 = vmax.f32 %v254_v41, 0.0  ;;  %v308_v36 = vpop.permute.xlu0 %307 }
  0xd0   :  { %v628_v38 = vpop.f32.mrf.mxu0 }
  0xd1   :  { %v264_v39 = vadd.f32 %v628_v38, %v131_v30  ;;  %v271_v51 = vmax.f32 %v249_v45, 0.0 }
  0xd2   :  { %v258_v40 = vpop.f32.mrf.mxu0 }
  0xd3   :  { %v274_v42 = vmax.f32 %v264_v39, 0.0  ;;  %v259_v43 = vadd.f32 %v258_v40, %v126_v35  ;;  %v303_v35 = vpop.permute.xlu1 %302 }
  0xd5   :  { %v273_v46 = vmax.f32 %v259_v43, 0.0  ;;  %629 = vmatprep.subr.mxu0 %v274_v42  ;;  %657 = vmatprep.subr.mxu1 %v274_v42 }
  0xd6   :  { %630 = vmatpush3.msra.mxu0 %v274_v42  ;;  %665 = vmatpush3.msra.mxu1 %v274_v42 }
  0xd7   :  { %631 = vmatprep.subr.mxu0 %v273_v46  ;;  %658 = vmatprep.subr.mxu1 %v273_v46  ;;  %v313_v47 = vpop.permute.xlu1 %312 }
  0xd8   :  { %632 = vmatpush3.msra.mxu0 %v273_v46  ;;  %666 = vmatpush3.msra.mxu1 %v273_v46 }
  0xd9   :  { %633 = vmatprep.subr.mxu0 %v272_v49  ;;  %659 = vmatprep.subr.mxu1 %v272_v49 }
  0xda   :  { %634 = vmatpush3.msra.mxu0 %v272_v49  ;;  %667 = vmatpush3.msra.mxu1 %v272_v49 }
  0xdb   :  { %635 = vmatprep.subr.mxu0 %v271_v51  ;;  %660 = vmatprep.subr.mxu1 %v271_v51 }
  0xdc   :  { %636 = vmatpush3.msra.mxu0 %v271_v51  ;;  %668 = vmatpush3.msra.mxu1 %v271_v51 }
  0xdd   :  { %637 = vmatprep.subr.mxu0 %v270_v54  ;;  %661 = vmatprep.subr.mxu1 %v270_v54 }
  0xde   :  { %638 = vmatpush3.msra.mxu0 %v270_v54  ;;  %669 = vmatpush3.msra.mxu1 %v270_v54 }
  0xdf   :  { %639 = vmatprep.subr.mxu0 %v269_v57  ;;  %662 = vmatprep.subr.mxu1 %v269_v57 }
  0xe0   :  { %640 = vmatpush3.msra.mxu0 %v269_v57  ;;  %670 = vmatpush3.msra.mxu1 %v269_v57 }
  0xe1   :  { %641 = vmatprep.subr.mxu0 %v268_v58  ;;  %663 = vmatprep.subr.mxu1 %v268_v58 }
  0xe2   :  { %642 = vmatpush3.msra.mxu0 %v268_v58  ;;  %671 = vmatpush3.msra.mxu1 %v268_v58 }
  0xe3   :  { %643 = vmatprep.subr.mxu0 %v267_v59  ;;  %664 = vmatprep.subr.mxu1 %v267_v59 }
  0xe4   :  { %644 = vmatpush3.msra.mxu0 %v267_v59  ;;  %672 = vmatpush3.msra.mxu1 %v267_v59  ;;  %v456_v59 = vld [vmem:[%s1026_s5 + $0x18] sm:$0xff] }
  0xe5   :  { %646 = vmatmul.mubr.msk.f32.vlgmr.msra.gmra.mxu0 %vm315_vm2, %v78_v60  ;;  %649 = vmatmul.mubr.msk.f32.vlgmr.msra.gmra.mxu1 %vm315_vm2, %v80_v61  ;;  %v454_v60 = vld [vmem:[%s1026_s5 + $0x8] sm:$0xff] }
  0xe6   :  { %651 = vmatprep.mubr.msk.f32.mxu1 %vm315_vm2, %v81_v62 }
  0xe9   :  { %652 = vmatmul.mubr.msk.f32.gmra.mxu1 %vm315_vm2, %v82_v63 }
  0xea   :  { %654 = vmatprep.mubr.msk.f32.mxu1 %vm315_vm2, %v83_v0 }
  0xed   :  { %655 = vmatmul.mubr.msk.f32.gmra.mxu1 %vm315_vm2, %v84_v1  ;;  %v453_v1 = vld [vmem:[%s1026_s5] sm:$0xff] }
 0x1a5   :  { %v647_v6 = vpop.f32.mrf.mxu0  ;;  %v650_v7 = vpop.f32.mrf.mxu1 }
 0x1a6   :  { %v412_v9 = vadd.f32 %v647_v6, %v283_v3  ;;  %v422_v10 = vadd.f32 %v650_v7, %v293_v5  ;;  %v455_v7 = vld [vmem:[%s1026_s5 + $0x10] sm:$0xff] }
 0x1a7   :  { %v406_v11 = vpop.f32.mrf.mxu0  ;;  %v416_v12 = vpop.f32.mrf.mxu1 }
 0x1a8   :  { %v446_v13 = vmax.f32 %v412_v9, 0.0  ;;  %v448_v14 = vmax.f32 %v422_v10, 0.0  ;;  %v407_v15 = vadd.f32 %v406_v11, %v278_v4  ;;  %v417_v16 = vadd.f32 %v416_v12, %v288_v8  ;;  %v505_v8 = vld [vmem:[%s1027_s6 + $0x10] sm:$0xff] }
 0x1a9   :  { %v653_v17 = vpop.f32.mrf.mxu1 }
 0x1aa   :  { %v445_v18 = vmax.f32 %v407_v15, 0.0  ;;  %v471_v19 = vsel %vm461_vm4, %v448_v14, 0.0  ;;  %v447_v20 = vmax.f32 %v417_v16, 0.0  ;;  %v465_v21 = vsel %vm461_vm4, %v446_v13, 0.0 }
 0x1ab   :  { %472 = vadd.xlane.f32.xlu0 %v471_v19  ;;  %v426_v22 = vpop.f32.mrf.mxu1  ;;  %466 = vadd.xlane.f32.xlu1 %v465_v21  ;;  %v512_v31 = vmul.f32 %v446_v13, %v446_v13  ;;  %v432_v37 = vadd.f32 %v653_v17, %v303_v35  ;;  %v514_v39 = vmul.f32 %v448_v14, %v448_v14  ;;  %v504_v13 = vld [vmem:[%s1027_s6 + $0x8] sm:$0xff]  ;;  %v457_v14 = vld [vmem:[%s1026_s5 + $0x20] sm:$0xff]  ;;  %v506_v19 = vld [vmem:[%s1027_s6 + $0x18] sm:$0xff] }
 0x1ac   :  { %v511_v23 = vmul.f32 %v445_v18, %v445_v18  ;;  %v462_v26 = vsel %vm461_vm4, %v445_v18, 0.0  ;;  %v427_v27 = vadd.f32 %v426_v22, %v298_v24  ;;  %v513_v28 = vmul.f32 %v447_v20, %v447_v20 }
 0x1ad   :  { %v656_v29 = vpop.f32.mrf.mxu1  ;;  %v468_v30 = vsel %vm461_vm4, %v447_v20, 0.0  ;;  %v522_v38 = vsel %vm461_vm4, %v512_v31, 0.0  ;;  %v450_v43 = vmax.f32 %v432_v37, 0.0  ;;  %v528_v44 = vsel %vm461_vm4, %v514_v39, 0.0  ;;  %v507_v20 = vld [vmem:[%s1027_s6 + $0x20] sm:$0xff]  ;;  %v508_v31 = vld [vmem:[%s1027_s6 + $0x28] sm:$0xff] }
 0x1ae   :  { %v519_v25 = vsel %vm461_vm4, %v511_v23, 0.0  ;;  %v449_v32 = vmax.f32 %v427_v27, 0.0  ;;  %v525_v33 = vsel %vm461_vm4, %v513_v28, 0.0  ;;  %v442_v48 = vadd.f32 %v656_v29, %v313_v47  ;;  %v460_v37 = vld [vmem:[%s1026_s5 + $0x38] sm:$0xff] }
 0x1af   :  { %463 = vadd.xlane.f32.xlu0 %v462_v26  ;;  %520 = vadd.xlane.f32.xlu1 %v519_v25  ;;  %v436_v34 = vpop.f32.mrf.mxu1  ;;  %v477_v49 = vsel %vm461_vm4, %v450_v43, 0.0  ;;  %v516_v50 = vmul.f32 %v450_v43, %v450_v43  ;;  %v458_v25 = vld [vmem:[%s1026_s5 + $0x28] sm:$0xff]  ;;  %v459_v26 = vld [vmem:[%s1026_s5 + $0x30] sm:$0xff] }
 0x1b0   :  { %v437_v40 = vadd.f32 %v436_v34, %v308_v36  ;;  %v474_v41 = vsel %vm461_vm4, %v449_v32, 0.0  ;;  %v515_v42 = vmul.f32 %v449_v32, %v449_v32  ;;  %v452_v53 = vmax.f32 %v442_v48, 0.0  ;;  %v509_v32 = vld [vmem:[%s1027_s6 + $0x30] sm:$0xff] }
 0x1b1   :  { %v534_v54 = vsel %vm461_vm4, %v516_v50, 0.0 }
 0x1b2   :  { %v451_v45 = vmax.f32 %v437_v40, 0.0  ;;  %v531_v46 = vsel %vm461_vm4, %v515_v42, 0.0  ;;  %v483_v56 = vsel %vm461_vm4, %v452_v53, 0.0  ;;  %v518_v57 = vmul.f32 %v452_v53, %v452_v53  ;;  %v510_v40 = vld [vmem:[%s1027_s6 + $0x38] sm:$0xff] }
 0x1b3   :  { %469 = vadd.xlane.f32.xlu0 %v468_v30  ;;  %526 = vadd.xlane.f32.xlu1 %v525_v33 }
 0x1b4   :  { %v480_v51 = vsel %vm461_vm4, %v451_v45, 0.0  ;;  %v517_v52 = vmul.f32 %v451_v45, %v451_v45  ;;  %v540_v58 = vsel %vm461_vm4, %v518_v57, 0.0 }
 0x1b6   :  { %v537_v55 = vsel %vm461_vm4, %v517_v52, 0.0 }
 0x1b7   :  { %523 = vadd.xlane.f32.xlu0 %v522_v38  ;;  %475 = vadd.xlane.f32.xlu1 %v474_v41 }
 0x1bb   :  { %529 = vadd.xlane.f32.xlu0 %v528_v44  ;;  %532 = vadd.xlane.f32.xlu1 %v531_v46 }
 0x1bf   :  { %478 = vadd.xlane.f32.xlu0 %v477_v49  ;;  %481 = vadd.xlane.f32.xlu1 %v480_v51 }
 0x1c3   :  { %535 = vadd.xlane.f32.xlu0 %v534_v54  ;;  %538 = vadd.xlane.f32.xlu1 %v537_v55 }
 0x1c7   :  { %484 = vadd.xlane.f32.xlu0 %v483_v56 }
 0x1cb   :  { %541 = vadd.xlane.f32.xlu0 %v540_v58 }
 0x234   :  { %v473_v61 = vpop.xlane.xlu0 %472  ;;  %v467_v63 = vpop.xlane.xlu1 %466 }
 0x235   :  { %v489_v62 = vadd.f32 %v473_v61, %v456_v59  ;;  %v487_v0 = vadd.f32 %v467_v63, %v454_v60 }
 0x237   :  { %498 = vst.msk [vmem:[%s1026_s5 + $0x18] sm:$0xff] %vm43_vm3, %v489_v62  ;;  %496 = vst.msk [vmem:[%s1026_s5 + $0x8] sm:$0xff] %vm43_vm3, %v487_v0 }
 0x238   :  { %v464_v3 = vpop.xlane.xlu0 %463  ;;  %v521_v4 = vpop.xlane.xlu1 %520 }
 0x239   :  { %v486_v5 = vadd.f32 %v464_v3, %v453_v1  ;;  %v543_v6 = vadd.f32 %v521_v4, %v503_v2 }
 0x23b   :  { %495 = vst.msk [vmem:[%s1026_s5] sm:$0xff] %vm43_vm3, %v486_v5  ;;  %551 = vst.msk [vmem:[%s1027_s6] sm:$0xff] %vm43_vm3, %v543_v6 }
 0x23c   :  { %v470_v9 = vpop.xlane.xlu0 %469  ;;  %v527_v10 = vpop.xlane.xlu1 %526 }
 0x23d   :  { %v488_v11 = vadd.f32 %v470_v9, %v455_v7  ;;  %v545_v12 = vadd.f32 %v527_v10, %v505_v8 }
 0x23f   :  { %497 = vst.msk [vmem:[%s1026_s5 + $0x10] sm:$0xff] %vm43_vm3, %v488_v11  ;;  %553 = vst.msk [vmem:[%s1027_s6 + $0x10] sm:$0xff] %vm43_vm3, %v545_v12 }
 0x240   :  { %v524_v15 = vpop.xlane.xlu0 %523  ;;  %v476_v16 = vpop.xlane.xlu1 %475 }
 0x241   :  { %v544_v17 = vadd.f32 %v524_v15, %v504_v13  ;;  %v490_v18 = vadd.f32 %v476_v16, %v457_v14 }
 0x243   :  { %552 = vst.msk [vmem:[%s1027_s6 + $0x8] sm:$0xff] %vm43_vm3, %v544_v17  ;;  %499 = vst.msk [vmem:[%s1026_s5 + $0x20] sm:$0xff] %vm43_vm3, %v490_v18 }
 0x244   :  { %v530_v21 = vpop.xlane.xlu0 %529  ;;  %v533_v22 = vpop.xlane.xlu1 %532 }
 0x245   :  { %v546_v23 = vadd.f32 %v530_v21, %v506_v19  ;;  %v547_v24 = vadd.f32 %v533_v22, %v507_v20 }
 0x247   :  { %554 = vst.msk [vmem:[%s1027_s6 + $0x18] sm:$0xff] %vm43_vm3, %v546_v23  ;;  %555 = vst.msk [vmem:[%s1027_s6 + $0x20] sm:$0xff] %vm43_vm3, %v547_v24 }
 0x248   :  { %v479_v27 = vpop.xlane.xlu0 %478  ;;  %v482_v28 = vpop.xlane.xlu1 %481 }
 0x249   :  { %v491_v29 = vadd.f32 %v479_v27, %v458_v25  ;;  %v492_v30 = vadd.f32 %v482_v28, %v459_v26 }
 0x24b   :  { %500 = vst.msk [vmem:[%s1026_s5 + $0x28] sm:$0xff] %vm43_vm3, %v491_v29  ;;  %501 = vst.msk [vmem:[%s1026_s5 + $0x30] sm:$0xff] %vm43_vm3, %v492_v30 }
 0x24c   :  { %v536_v33 = vpop.xlane.xlu0 %535  ;;  %v539_v34 = vpop.xlane.xlu1 %538 }
 0x24d   :  { %v548_v35 = vadd.f32 %v536_v33, %v508_v31  ;;  %v549_v36 = vadd.f32 %v539_v34, %v509_v32 }
 0x24f   :  { %556 = vst.msk [vmem:[%s1027_s6 + $0x28] sm:$0xff] %vm43_vm3, %v548_v35  ;;  %557 = vst.msk [vmem:[%s1027_s6 + $0x30] sm:$0xff] %vm43_vm3, %v549_v36 }
 0x250   :  { %v485_v38 = vpop.xlane.xlu0 %484 }
 0x251   :  { %v493_v39 = vadd.f32 %v485_v38, %v460_v37 }
 0x253   :  { %502 = vst.msk [vmem:[%s1026_s5 + $0x38] sm:$0xff] %vm43_vm3, %v493_v39 }
 0x254   :  { %v542_v41 = vpop.xlane.xlu0 %541 }
 0x255   :  { %v550_v42 = vadd.f32 %v542_v41, %v510_v40 }
 0x257   :  { %558 = vst.msk [vmem:[%s1027_s6 + $0x38] sm:$0xff] %vm43_vm3, %v550_v42 }

</bundles_post_ra>
